<compile_context>
chip_gen: v5e
topology: v5e:2x2
jax: 0.10.0
libtpu: 0.0.40
codegen_flags: <defaults>
</compile_context>

<pallas_src>
import jax
import jax.numpy as jnp
from jax.experimental import pallas as pl
from jax.experimental.pallas import tpu as pltpu

# Small, TPU-friendly shapes (lane dims are full-array or multiples of 128).
B = 8        # batch (small test case)
D_Z = 16     # latent dim
H = 32       # hidden dim of decoder_net
FEAT = 128   # number of features (decoder_net outputs 2*FEAT)

_P_EPS = 1e-7


def _round_up(x, m):
    return (x + m - 1) // m * m


def _softplus(x):
    # Numerically stable softplus: max(x, 0) + log1p(exp(-|x|))
    return jnp.maximum(x, 0.0) + jnp.log1p(jnp.exp(-jnp.abs(x)))


def _make_kernel(feat):
    def nb_decoder_kernel(z_ref, w1_ref, b1_ref, w2_ref, b2_ref, r_ref, p_ref):
        # decoder_net: Linear -> ReLU -> Linear   (MXU matmuls, f32 accumulation)
        h = jnp.dot(z_ref[...], w1_ref[...], preferred_element_type=jnp.float32)
        h = jnp.maximum(h + b1_ref[...], 0.0)                  # (TB, H) + (1, H), ReLU

        out = jnp.dot(h, w2_ref[...], preferred_element_type=jnp.float32)
        out = out + b2_ref[...]                                # (TB, 2*FEAT)

        # torch.chunk(out, 2, dim=-1) -- slice at a multiple of 128, lane-aligned (free).
        mu = _softplus(out[:, :feat])
        theta = _softplus(out[:, feat:])

        # p = theta / (theta + mu): approx reciprocal on the EUP + one Newton-Raphson
        # refinement on the VPU -> ~f32 accuracy without an extra EUP divide.
        denom = theta + mu
        r0 = pl.reciprocal(denom, approx=True)
        inv = r0 * (2.0 - denom * r0)
        p = theta * inv
        # Keep probs strictly inside (0, 1); exact 0/1 (softplus underflow) is an
        # invalid NegativeBinomial parameterization.
        p = jnp.clip(p, _P_EPS, 1.0 - _P_EPS)

        r_ref[...] = theta
        p_ref[...] = p

    return nb_decoder_kernel


def nb_decoder_forward(z, w1, b1, w2, b2, *, tb_max=1024):
    """Returns (total_count, probs) of the Independent NegativeBinomial over features."""
    batch, d_z = z.shape
    hdim = w1.shape[1]
    two_f = w2.shape[1]
    feat = two_f // 2

    # Batch tile: up to tb_max rows per grid step, sublane-aligned (multiple of 8).
    tb = min(tb_max, _round_up(batch, 8))
    padded = _round_up(batch, tb)
    if padded != batch:
        z = jnp.pad(z, ((0, padded - batch), (0, 0)))
    grid = (padded // tb,)

    r, p = pl.pallas_call(
        _make_kernel(feat),
        out_shape=(
            jax.ShapeDtypeStruct((padded, feat), jnp.float32),
            jax.ShapeDtypeStruct((padded, feat), jnp.float32),
        ),
        grid=grid,
        in_specs=[
            pl.BlockSpec((tb, d_z), lambda i: (i, 0)),         # stream z tiles
            pl.BlockSpec((d_z, hdim), lambda i: (0, 0)),       # grid-resident weights
            pl.BlockSpec((1, hdim), lambda i: (0, 0)),
            pl.BlockSpec((hdim, two_f), lambda i: (0, 0)),
            pl.BlockSpec((1, two_f), lambda i: (0, 0)),
        ],
        out_specs=(
            pl.BlockSpec((tb, feat), lambda i: (i, 0)),
            pl.BlockSpec((tb, feat), lambda i: (i, 0)),
        ),
        compiler_params=pltpu.CompilerParams(
            dimension_semantics=("parallel",),                 # shard batch over TCs (v7x)
            vmem_limit_bytes=64 * 1024 * 1024,
        ),
    )(z, w1, b1, w2, b2)

    if padded != batch:
        r = r[:batch]
        p = p[:batch]
    return r, p


def init_params(key):
    k1, k2, k3, k4 = jax.random.split(key, 4)
    w1 = jax.random.normal(k1, (D_Z, H), jnp.float32) * 0.1
    b1 = jax.random.normal(k2, (1, H), jnp.float32) * 0.1
    w2 = jax.random.normal(k3, (H, 2 * FEAT), jnp.float32) * 0.1
    b2 = jax.random.normal(k4, (1, 2 * FEAT), jnp.float32) * 0.1
    return w1, b1, w2, b2


if __name__ == "__main__":
    key = jax.random.PRNGKey(0)
    kz, kp = jax.random.split(key)
    w1, b1, w2, b2 = init_params(kp)

    def reference(z):
        # Plain-JAX reference (same math as the PyTorch forward).
        h_ref = jnp.maximum(z @ w1 + b1, 0.0)
        out_ref = h_ref @ w2 + b2
        mu_ref = jax.nn.softplus(out_ref[:, :FEAT])
        theta_ref = jax.nn.softplus(out_ref[:, FEAT:])
        p_ref = jnp.clip(theta_ref / (theta_ref + mu_ref), _P_EPS, 1.0 - _P_EPS)
        return theta_ref, p_ref

    # Small, single-tile case (tile collapses to the 8-row batch).
    z_small = jax.random.normal(kz, (B, D_Z), jnp.float32)
    r, p = nb_decoder_forward(z_small, w1, b1, w2, b2)
    jax.block_until_ready((r, p))
    r_ref, p_ref = reference(z_small)
    assert jnp.allclose(r, r_ref, atol=1e-5, rtol=1e-5)
    assert jnp.allclose(p, p_ref, atol=1e-4, rtol=1e-4)
    assert jnp.all(p > 0.0) and jnp.all(p < 1.0)

    # Multi-tile + batch-padding path (tiny tb_max so a small batch exercises the grid).
    z_multi = jax.random.normal(jax.random.PRNGKey(1), (50, D_Z), jnp.float32)
    r2, p2 = nb_decoder_forward(z_multi, w1, b1, w2, b2, tb_max=16)
    jax.block_until_ready((r2, p2))
    r2_ref, p2_ref = reference(z_multi)
    assert r2.shape == (50, FEAT) and p2.shape == (50, FEAT)
    assert jnp.allclose(r2, r2_ref, atol=1e-5, rtol=1e-5)
    assert jnp.allclose(p2, p2_ref, atol=1e-4, rtol=1e-4)

    # TODO(synk): td.Independent(td.NegativeBinomial(...)) distribution object (log_prob /
    # sampling) is returned by the torch module; the kernel emits its parameters (r, p).
    print("KERNEL_OK")
</pallas_src>

<mosaic_0001>
module attributes {stable_mosaic.version = 11 : i64} {
  func.func @nb_decoder_kernel(%arg0: i32, %arg1: memref<8x16xf32, #tpu.memory_space<vmem>>, %arg2: memref<16x32xf32, #tpu.memory_space<vmem>>, %arg3: memref<1x32xf32, #tpu.memory_space<vmem>>, %arg4: memref<32x256xf32, #tpu.memory_space<vmem>>, %arg5: memref<1x256xf32, #tpu.memory_space<vmem>>, %arg6: memref<8x128xf32, #tpu.memory_space<vmem>>, %arg7: memref<8x128xf32, #tpu.memory_space<vmem>>) attributes {dimension_semantics = [#tpu.dimension_semantics<parallel>], iteration_bounds = array<i64: 1>, scalar_prefetch = 0 : i64, scratch_operands = 0 : i64, tpu.core_type = #tpu.core_type<tc>, window_params = [{transform_indices = @transform_0, window_bounds = array<i64: 8, 16>}, {pipeline_mode = #tpu.pipeline_mode<synchronous>, transform_indices = @transform_1, window_bounds = array<i64: 16, 32>}, {pipeline_mode = #tpu.pipeline_mode<synchronous>, transform_indices = @transform_2, window_bounds = array<i64: 1, 32>}, {pipeline_mode = #tpu.pipeline_mode<synchronous>, transform_indices = @transform_3, window_bounds = array<i64: 32, 256>}, {pipeline_mode = #tpu.pipeline_mode<synchronous>, transform_indices = @transform_4, window_bounds = array<i64: 1, 256>}, {transform_indices = @transform_5, window_bounds = array<i64: 8, 128>}, {transform_indices = @transform_6, window_bounds = array<i64: 8, 128>}]} {
    %c0 = arith.constant 0 : index
    %c0_0 = arith.constant 0 : index
    %0 = vector.load %arg1[%c0, %c0_0] : memref<8x16xf32, #tpu.memory_space<vmem>>, vector<8x16xf32>
    %c0_1 = arith.constant 0 : index
    %c0_2 = arith.constant 0 : index
    %1 = vector.load %arg2[%c0_1, %c0_2] : memref<16x32xf32, #tpu.memory_space<vmem>>, vector<16x32xf32>
    %cst = arith.constant dense<0.000000e+00> : vector<8x32xf32>
    %2 = tpu.matmul %0, %1, %cst {dimension_numbers = #tpu.dot_dimension_numbers<[1], [0], [0], [1], [0, 0, 1, 1], [], []>} : vector<8x16xf32>, vector<16x32xf32>, vector<8x32xf32> -> vector<8x32xf32>
    %c0_3 = arith.constant 0 : index
    %c0_4 = arith.constant 0 : index
    %3 = vector.load %arg3[%c0_3, %c0_4] : memref<1x32xf32, #tpu.memory_space<vmem>>, vector<1x32xf32>
    %4 = vector.broadcast %3 : vector<1x32xf32> to vector<8x32xf32>
    %5 = arith.addf %2, %4 : vector<8x32xf32>
    %cst_5 = arith.constant 0.000000e+00 : f32
    %6 = vector.broadcast %cst_5 : f32 to vector<8x32xf32>
    %7 = arith.maximumf %5, %6 : vector<8x32xf32>
    %c0_6 = arith.constant 0 : index
    %c0_7 = arith.constant 0 : index
    %8 = vector.load %arg4[%c0_6, %c0_7] : memref<32x256xf32, #tpu.memory_space<vmem>>, vector<32x256xf32>
    %cst_8 = arith.constant dense<0.000000e+00> : vector<8x256xf32>
    %9 = tpu.matmul %7, %8, %cst_8 {dimension_numbers = #tpu.dot_dimension_numbers<[1], [0], [0], [1], [0, 0, 1, 1], [], []>} : vector<8x32xf32>, vector<32x256xf32>, vector<8x256xf32> -> vector<8x256xf32>
    %c0_9 = arith.constant 0 : index
    %c0_10 = arith.constant 0 : index
    %10 = vector.load %arg5[%c0_9, %c0_10] : memref<1x256xf32, #tpu.memory_space<vmem>>, vector<1x256xf32>
    %11 = vector.broadcast %10 : vector<1x256xf32> to vector<8x256xf32>
    %12 = arith.addf %9, %11 : vector<8x256xf32>
    %13 = vector.extract_strided_slice %12 {offsets = [0, 0], sizes = [8, 128], strides = [1, 1]} : vector<8x256xf32> to vector<8x128xf32>
    %cst_11 = arith.constant 0.000000e+00 : f32
    %14 = vector.broadcast %cst_11 : f32 to vector<8x128xf32>
    %15 = arith.maximumf %13, %14 : vector<8x128xf32>
    %16 = math.absf %13 : vector<8x128xf32>
    %cst_12 = arith.constant 0.000000e+00 : f32
    %17 = vector.broadcast %cst_12 : f32 to vector<8x128xf32>
    %18 = arith.subf %17, %16 : vector<8x128xf32>
    %19 = math.exp %18 : vector<8x128xf32>
    %20 = math.log1p %19 : vector<8x128xf32>
    %21 = arith.addf %15, %20 : vector<8x128xf32>
    %22 = vector.extract_strided_slice %12 {offsets = [0, 128], sizes = [8, 128], strides = [1, 1]} : vector<8x256xf32> to vector<8x128xf32>
    %cst_13 = arith.constant 0.000000e+00 : f32
    %23 = vector.broadcast %cst_13 : f32 to vector<8x128xf32>
    %24 = arith.maximumf %22, %23 : vector<8x128xf32>
    %25 = math.absf %22 : vector<8x128xf32>
    %cst_14 = arith.constant 0.000000e+00 : f32
    %26 = vector.broadcast %cst_14 : f32 to vector<8x128xf32>
    %27 = arith.subf %26, %25 : vector<8x128xf32>
    %28 = math.exp %27 : vector<8x128xf32>
    %29 = math.log1p %28 : vector<8x128xf32>
    %30 = arith.addf %24, %29 : vector<8x128xf32>
    %31 = arith.addf %30, %21 : vector<8x128xf32>
    %32 = tpu.reciprocal %31 {approx = true} : vector<8x128xf32> -> vector<8x128xf32>
    %33 = arith.mulf %31, %32 : vector<8x128xf32>
    %cst_15 = arith.constant 2.000000e+00 : f32
    %34 = vector.broadcast %cst_15 : f32 to vector<8x128xf32>
    %35 = arith.subf %34, %33 : vector<8x128xf32>
    %36 = arith.mulf %32, %35 : vector<8x128xf32>
    %37 = arith.mulf %30, %36 : vector<8x128xf32>
    %cst_16 = arith.constant 1.000000e-07 : f32
    %cst_17 = arith.constant 0.99999988 : f32
    %38 = vector.broadcast %cst_16 : f32 to vector<8x128xf32>
    %39 = arith.maximumf %38, %37 : vector<8x128xf32>
    %40 = vector.broadcast %cst_17 : f32 to vector<8x128xf32>
    %41 = arith.minimumf %40, %39 : vector<8x128xf32>
    %c0_18 = arith.constant 0 : index
    %c0_19 = arith.constant 0 : index
    %42 = vector.load %arg6[%c0_18, %c0_19] : memref<8x128xf32, #tpu.memory_space<vmem>>, vector<8x128xf32>
    tpu.vector_store %arg6[%c0_18, %c0_19], %30 {strides = array<i32>} : memref<8x128xf32, #tpu.memory_space<vmem>>, vector<8x128xf32>,
    %c0_20 = arith.constant 0 : index
    %c0_21 = arith.constant 0 : index
    %43 = vector.load %arg7[%c0_20, %c0_21] : memref<8x128xf32, #tpu.memory_space<vmem>>, vector<8x128xf32>
    tpu.vector_store %arg7[%c0_20, %c0_21], %41 {strides = array<i32>} : memref<8x128xf32, #tpu.memory_space<vmem>>, vector<8x128xf32>,
    return
  }
  func.func @transform_0(%arg0: i32) -> (i32, i32) {
    %c0_i32 = arith.constant 0 : i32
    %c0_i32_0 = arith.constant 0 : i32
    return %arg0, %c0_i32 : i32, i32
  }
  func.func @transform_1(%arg0: i32) -> (i32, i32) {
    %c0_i32 = arith.constant 0 : i32
    %c0_i32_0 = arith.constant 0 : i32
    %c0_i32_1 = arith.constant 0 : i32
    return %c0_i32, %c0_i32_0 : i32, i32
  }
  func.func @transform_2(%arg0: i32) -> (i32, i32) {
    %c0_i32 = arith.constant 0 : i32
    %c0_i32_0 = arith.constant 0 : i32
    %c0_i32_1 = arith.constant 0 : i32
    return %c0_i32, %c0_i32_0 : i32, i32
  }
  func.func @transform_3(%arg0: i32) -> (i32, i32) {
    %c0_i32 = arith.constant 0 : i32
    %c0_i32_0 = arith.constant 0 : i32
    %c0_i32_1 = arith.constant 0 : i32
    return %c0_i32, %c0_i32_0 : i32, i32
  }
  func.func @transform_4(%arg0: i32) -> (i32, i32) {
    %c0_i32 = arith.constant 0 : i32
    %c0_i32_0 = arith.constant 0 : i32
    %c0_i32_1 = arith.constant 0 : i32
    return %c0_i32, %c0_i32_0 : i32, i32
  }
  func.func @transform_5(%arg0: i32) -> (i32, i32) {
    %c0_i32 = arith.constant 0 : i32
    %c0_i32_0 = arith.constant 0 : i32
    return %arg0, %c0_i32 : i32, i32
  }
  func.func @transform_6(%arg0: i32) -> (i32, i32) {
    %c0_i32 = arith.constant 0 : i32
    %c0_i32_0 = arith.constant 0 : i32
    return %arg0, %c0_i32 : i32, i32
  }
}

</mosaic_0001>

<bundles_post_ra>
// kernel: tpu_custom_call.1
= control target key start
LH: loop header
LB: loop body
LE: loop exit
PB: predicated region body
PF: predicated region fallthrough
CT: control target
= control target key end

     0   :  { %12 = vsyncpa [#allocation3], 0  ;;  %s449_s0 = inlined_call_operand.hbm [shape: f32[8,16], index: 0, kind: input, shape index: {}]   ;;  %s450_s1 = inlined_call_operand.hbm [shape: f32[16,32], index: 1, kind: input, shape index: {}]   ;;  %s451_s2 = inlined_call_operand.vmem [shape: f32[1,32], index: 2, kind: input, shape index: {}]   ;;  %s452_s3 = inlined_call_operand.hbm [shape: f32[32,256], index: 3, kind: input, shape index: {}]   ;;  %s453_s4 = inlined_call_operand.vmem [shape: f32[1,256], index: 4, kind: input, shape index: {}]   ;;  %s454_s5 = inlined_call_operand.hbm [shape: f32[8,128], index: 5, kind: output, shape index: {0}]   ;;  %s455_s6 = inlined_call_operand.hbm [shape: f32[8,128], index: 6, kind: output, shape index: {1}]  }
   0x1   :  { %13 = vsyncpa [#allocation6], 0 }
   0x2   :  { %14 = vsyncpa [#allocation4], 0  ;;  %s31_s23 = sshll.u32 %s450_s1, 4  ;;  %s32_s23 = int_to_ptr.hbm [resolvable:$true] %s31_s23 }
   0x3   :  { %15 = vsyncpa [#allocation10], 0  ;;  %s384_s24 = smov [#allocation5]   ;;  %s21_s28 = sshll.u32 %s449_s0, 4  ;;  %s22_s28 = int_to_ptr.hbm [resolvable:$true] %s21_s28 }
   0x4   :  { %s33_s25 = sshll.u32 %s384_s24, 4  ;;  %s385_s29 = smov 128   ;;  %s34_s25 = int_to_ptr.vmem [resolvable:$true] %s33_s25 }
   0x5   :  { %s386_s30 = smov 8   ;;  %s387_s7 = smov [#allocation2]  }
   0x6   :  { %39 = dma.hbm_to_vmem [thread:$0]  %s32_s23, 256, %s34_s25, [#allocation6], %s385_s29, %s385_s29, %s386_s30  }
   0x7   :  { %s23_s8 = sshll.u32 %s387_s7, 4  ;;  %s46_s11 = sshll.u32 %s452_s3, 4  ;;  %s24_s8 = int_to_ptr.vmem [resolvable:$true] %s23_s8  ;;  %s47_s11 = int_to_ptr.hbm [resolvable:$true] %s46_s11 }
   0x8   :  { %26 = dma.hbm_to_vmem [thread:$0]  %s22_s28, 128, %s24_s8, [#allocation3]  }
   0x9   :  { %s388_s1 = smov [#allocation7]   ;;  %s389_s13 = smov 256  }
   0xa   :  { %s48_s12 = sshll.u32 %s388_s1, 4  ;;  %s390_s14 = smov 16   ;;  %s49_s12 = int_to_ptr.vmem [resolvable:$true] %s48_s12 }
   0xb   :  { %54 = dma.hbm_to_vmem [thread:$0]  %s47_s11, 1024, %s49_s12, [#allocation6], %s389_s13, %s389_s13, %s390_s14  }
   0xc   :  { %376 = dma.done.wait [#allocation3], 128  }
   0xd   :  { %377 = vsyncadd [#allocation3], 4294967168 }
   0xe   :  { %378 = dma.done.wait [#allocation6], 1280  }
   0xf   :  { %379 = vsyncadd [#allocation6], 4294966016  ;;  %v71_v0 = vld [vmem:[#allocation5 + $0x8] sm:$0xff]  ;;  %v70_v1 = vld [vmem:[#allocation5] sm:$0xff]  ;;  %vm76_vm0 = vcmask 130048   ;;  %vm115_vm1 = vcmask 261120  }
  0x10   :  { %v69_v2 = vld [vmem:[#allocation2] sm:$0xff]  ;;  %94 = vmatpush.msra.mxu0 %v71_v0  ;;  %v107_v3 = vld [vmem:[#allocation7 + $0x30] sm:$0xff]  ;;  %v108_v4 = vld [vmem:[#allocation7 + $0x38] sm:$0xff]  ;;  %s206_s19 = sshll.u32 %s454_s5, 4  ;;  %s392_s20 = smov [#allocation9]   ;;  %s207_s19 = int_to_ptr.hbm [resolvable:$true] %s206_s19 }
  0x11   :  { %131 = vmatpush.msra.mxu1 %v107_v3  ;;  %151 = vmatpush.msra.mxu2 %v108_v4  ;;  %v105_v5 = vld [vmem:[#allocation7 + $0x20] sm:$0xff]  ;;  %v106_v6 = vld [vmem:[#allocation7 + $0x28] sm:$0xff]  ;;  %v103_v7 = vld [vmem:[#allocation7 + $0x10] sm:$0xff]  ;;  %s215_s21 = sshll.u32 %s392_s20, 4  ;;  %s217_s23 = sshll.u32 %s455_s6, 4  ;;  %s216_s21 = int_to_ptr.vmem [resolvable:$true] %s215_s21  ;;  %s218_s23 = int_to_ptr.hbm [resolvable:$true] %s217_s23 }
  0x12   :  { %95 = vmatpush.msra.mxu0 %v70_v1  ;;  %v104_v8 = vld [vmem:[#allocation7 + $0x18] sm:$0xff]  ;;  %v101_v9 = vld [vmem:[#allocation7] sm:$0xff]  ;;  %v102_v10 = vld [vmem:[#allocation7 + $0x8] sm:$0xff] }
  0x13   :  { %233 = vmatmul.msk.f32.vlgmr.msra.gmra.mxu0 %vm76_vm0, %v69_v2  ;;  %132 = vmatpush.msra.mxu1 %v105_v5  ;;  %v245_v11 = vld [vmem:[%s451_s2] ss:$0 sm:$0xff]  ;;  %s391_s2 = smov [#allocation8]  }
  0x14   :  { %152 = vmatpush.msra.mxu2 %v106_v6  ;;  %v109_v15 = vld [vmem:[%s453_s4] sm:$0x3]  ;;  %s204_s4 = sshll.u32 %s391_s2, 4  ;;  %s205_s4 = int_to_ptr.vmem [resolvable:$true] %s204_s4 }
  0x15   :  { %133 = vmatpush.msra.mxu1 %v103_v7  ;;  %v111_v16 = vperm.slane %v109_v15, 0  ;;  %v112_v20 = vperm.slane %v109_v15, 1 }
  0x16   :  { %153 = vmatpush.msra.mxu2 %v104_v8 }
  0x17   :  { %134 = vmatpush.msra.mxu1 %v101_v9 }
  0x18   :  { %154 = vmatpush.msra.mxu2 %v102_v10 }
  0x90   :  { %v97_v12 = vpop.f32.mrf.mxu0 }
  0x91   :  { %v98_v13 = vadd.f32 %v245_v11, %v97_v12 }
  0x93   :  { %v100_v14 = vmax.f32 %v98_v13, 0.0 }
  0x95   :  { %234 = vmatmul.msk.f32.vlgmr.msra.gmra.mxu1 %vm115_vm1, %v100_v14  ;;  %235 = vmatmul.msk.f32.vlgmr.msra.gmra.mxu2 %vm115_vm1, %v100_v14 }
 0x112   :  { %v136_v17 = vpop.f32.mrf.mxu1 }
 0x113   :  { %v137_v18 = vadd.f32 %v136_v17, %v111_v16 }
 0x115   :  { %v160_v19 = vand.u32 2147483647, %v137_v18  ;;  %v159_v45 = vmax.f32 %v137_v18, 0.0 }
 0x117   :  { %v161_v21 = vsub.f32 0.0, %v160_v19 }
 0x118   :  { %v156_v22 = vpop.f32.mrf.mxu2 }
 0x119   :  { %v162_v23 = vmul.f32 1.442695, %v161_v21  ;;  %v157_v24 = vadd.f32 %v156_v22, %v112_v20 }
 0x11b   :  { %246 = vpow2.f32 %v162_v23  ;;  %v175_v25 = vand.u32 2147483647, %v157_v24  ;;  %v174_v46 = vmax.f32 %v157_v24, 0.0 }
 0x11d   :  { %v176_v26 = vsub.f32 0.0, %v175_v25 }
 0x11f   :  { %v177_v27 = vmul.f32 1.442695, %v176_v26 }
 0x121   :  { %v247_v28 = vpop.eup %246  ;;  %248 = vpow2.f32 %v177_v27 }
 0x122   :  { %v164_v29 = vadd.f32 1.0, %v247_v28  ;;  %v167_v31 = vmul.f32 -0.5, %v247_v28  ;;  %v170_v36 = vand.u32 2147483647, %v247_v28 }
 0x124   :  { %250 = vlog2.f32 %v164_v29  ;;  %v168_v35 = vadd.f32 1.0, %v167_v31  ;;  %vm171_vm2 = vcmp.lt.f32.partialorder %v170_v36, 0.0004427343 }
 0x126   :  { %v169_v40 = vmul.f32 %v247_v28, %v168_v35 }
 0x127   :  { %v249_v30 = vpop.eup %248 }
 0x128   :  { %v179_v32 = vadd.f32 1.0, %v249_v30  ;;  %v182_v33 = vmul.f32 -0.5, %v249_v30  ;;  %v185_v39 = vand.u32 2147483647, %v249_v30 }
 0x12a   :  { %v251_v34 = vpop.eup %250  ;;  %252 = vlog2.f32 %v179_v32  ;;  %v183_v38 = vadd.f32 1.0, %v182_v33  ;;  %vm186_vm3 = vcmp.lt.f32.partialorder %v185_v39, 0.0004427343 }
 0x12b   :  { %v166_v37 = vmul.f32 0.6931472, %v251_v34 }
 0x12c   :  { %v184_v44 = vmul.f32 %v249_v30, %v183_v38 }
 0x12d   :  { %v172_v42 = vsel %vm171_vm2, %v169_v40, %v166_v37 }
 0x12e   :  { %v173_v48 = vadd.f32 %v172_v42, %v159_v45 }
 0x130   :  { %v253_v41 = vpop.eup %252 }
 0x131   :  { %v181_v43 = vmul.f32 0.6931472, %v253_v41 }
 0x133   :  { %v187_v47 = vsel %vm186_vm3, %v184_v44, %v181_v43 }
 0x134   :  { %v188_v49 = vadd.f32 %v187_v47, %v174_v46 }
 0x136   :  { %v189_v50 = vadd.f32 %v188_v49, %v173_v48  ;;  %197 = vst [vmem:[#allocation8] sm:$0xff] %v188_v49 }
 0x137   :  { %209 = dma.vmem_to_hbm [thread:$0]  %s205_s4, 128, %s207_s19, [#allocation4]  }
 0x138   :  { %254 = vrcp.f32 %v189_v50 }
 0x13e   :  { %v255_v51 = vpop.eup %254 }
 0x13f   :  { %v191_v52 = vmul.f32 %v255_v51, %v189_v50 }
 0x141   :  { %v192_v53 = vsub.f32 2.0, %v191_v52 }
 0x143   :  { %v193_v54 = vmul.f32 %v255_v51, %v192_v53 }
 0x145   :  { %v194_v55 = vmul.f32 %v193_v54, %v188_v49 }
 0x147   :  { %v195_v56 = vmax.f32 %v194_v55, 1e-07 }
 0x149   :  { %v196_v57 = vmin.f32 %v195_v56, 0.9999999 }
 0x14b   :  { %198 = vst [vmem:[#allocation9] sm:$0xff] %v196_v57 }
 0x14c   :  { %220 = dma.vmem_to_hbm [thread:$0]  %s216_s21, 128, %s218_s23, [#allocation10]  }
 0x14d   :  { %380 = dma.done.wait [#allocation4], 128  }
 0x14e   :  { %381 = vsyncadd [#allocation4], 4294967168 }
 0x14f   :  { %382 = dma.done.wait [#allocation10], 128  }
 0x150   :  { %383 = vsyncadd [#allocation10], 4294967168 }
 0x151   :  { %229 = vsyncpa [#allocation3], 1 }
 0x152   :  { %230 = vsyncpa [#allocation6], 1 }
 0x153   :  { %231 = vsyncpa [#allocation4], 1 }
 0x154   :  { %232 = vsyncpa [#allocation10], 1 }

</bundles_post_ra>
